<compile_context>
chip_gen: v7x
topology: tpu7x:2x2x1
jax: 0.10.0
libtpu: 0.0.40
codegen_flags: <defaults>
</compile_context>

<pallas_src>
import numpy as np
import jax
import jax.numpy as jnp
from jax.experimental import pallas as pl
from jax.experimental.pallas import tpu as pltpu

_LANE = 128   # vreg lane width
_SUB = 8      # vreg sublane count (f32)


def _round_up(a, b):
    return -(-a // b) * b


def _make_pos_embed_kernel(freqs):
    """Kernel closed over the static frequency bands.

    x_ref: (tr, 128) lane-dense input tile.
    o_ref: (G, tr, 128) group-major output tile; each o_ref[g] store is a
           full-lane-width unmasked store.
    """
    def kernel(x_ref, o_ref):
        x = x_ref[...]                        # (tr, 128)
        o_ref[0] = x                          # identity group
        for i, f in enumerate(freqs):         # small, static unroll
            xf = x * jnp.float32(f)
            o_ref[1 + 2 * i] = jnp.sin(xf)
            o_ref[2 + 2 * i] = jnp.cos(xf)
    return kernel


def nerf_pos_embed(x, multires, row_tile=512):
    """x: (1, N, D) float32. Returns (N, D*(1+2*multires)) in PyTorch cat order."""
    assert x.shape[0] == 1, "module squeezes a leading batch dim of size 1"
    x2 = x[0]                                 # (N, D)
    n, d = x2.shape
    max_freq = multires - 1
    # torch.linspace(2**0, 2**max_freq, steps=multires) -> LINEAR spacing
    freqs = np.linspace(2.0 ** 0, 2.0 ** max_freq, multires).tolist()
    g = 1 + 2 * multires

    # Lane-dense layout: flatten (N, D) -> (L,), view as (rows, 128).
    L = n * d
    n_rows = _round_up(pl.cdiv(L, _LANE), _SUB)

    tr = min(int(row_tile), n_rows)           # n_rows, row_tile are multiples of 8
    # Keep >=2 grid steps when possible so v7x megacore can shard the row axis.
    if -(-n_rows // tr) < 2 and n_rows > _SUB:
        tr = _round_up(n_rows // 2, _SUB)
    n_rows_p = _round_up(n_rows, tr)          # pad rows so the tile always divides
    Lp = n_rows_p * _LANE

    x2d = jnp.pad(x2.reshape(L), (0, Lp - L)).reshape(n_rows_p, _LANE)

    out = pl.pallas_call(
        _make_pos_embed_kernel(freqs),
        out_shape=jax.ShapeDtypeStruct((g, n_rows_p, _LANE), x2.dtype),
        grid=(n_rows_p // tr,),
        in_specs=[pl.BlockSpec((tr, _LANE), lambda i: (i, 0))],
        out_specs=pl.BlockSpec((g, tr, _LANE), lambda i: (0, i, 0)),
        compiler_params=pltpu.CompilerParams(
            dimension_semantics=("parallel",)),
    )(x2d)

    # Group-major slab (G, Lp) -> drop pad -> (G, N, D) -> PyTorch cat order (N, G*D).
    out = out.reshape(g, Lp)[:, :L].reshape(g, n, d)
    return jnp.transpose(out, (1, 0, 2)).reshape(n, g * d)


def nerf_pos_embed_ref(x, multires):
    """Pure-JAX reference mirroring the PyTorch forward exactly."""
    x2 = x[0]
    max_freq = multires - 1
    freqs = np.linspace(2.0 ** 0, 2.0 ** max_freq, multires)
    outs = [x2]
    for f in freqs:
        outs.append(jnp.sin(x2 * jnp.float32(f)))
        outs.append(jnp.cos(x2 * jnp.float32(f)))
    return jnp.concatenate(outs, axis=1)


if __name__ == "__main__":
    multires = 4                  # -> 1 + 2*4 = 9 feature groups
    N, D = 100, 3                 # NeRF-style 3-D points; N*D not a multiple of 128
    key = jax.random.PRNGKey(0)
    x = jax.random.normal(key, (1, N, D), dtype=jnp.float32)

    out = nerf_pos_embed(x, multires)
    out = jax.block_until_ready(out)

    ref = nerf_pos_embed_ref(x, multires)
    assert out.shape == (N, D * (1 + 2 * multires)), out.shape
    assert jnp.allclose(out, ref, atol=1e-5, rtol=1e-5), "mismatch vs reference"

    print("KERNEL_OK")
</pallas_src>

<mosaic_0001>
module attributes {stable_mosaic.version = 11 : i64} {
  func.func @kernel(%arg0: i32, %arg1: memref<8x128xf32, #tpu.memory_space<vmem>>, %arg2: memref<9x8x128xf32, #tpu.memory_space<vmem>>) attributes {dimension_semantics = [#tpu.dimension_semantics<parallel>], iteration_bounds = array<i64: 1>, scalar_prefetch = 0 : i64, scratch_operands = 0 : i64, tpu.core_type = #tpu.core_type<tc>, window_params = [{transform_indices = @transform_0, window_bounds = array<i64: 8, 128>}, {transform_indices = @transform_1, window_bounds = array<i64: 9, 8, 128>}]} {
    %c0 = arith.constant 0 : index
    %c0_0 = arith.constant 0 : index
    %0 = vector.load %arg1[%c0, %c0_0] : memref<8x128xf32, #tpu.memory_space<vmem>>, vector<8x128xf32>
    %c0_1 = arith.constant 0 : index
    %c0_2 = arith.constant 0 : index
    %c0_3 = arith.constant 0 : index
    %1 = vector.load %arg2[%c0_1, %c0_2, %c0_3] : memref<9x8x128xf32, #tpu.memory_space<vmem>>, vector<1x8x128xf32>
    %2 = vector.shape_cast %1 : vector<1x8x128xf32> to vector<8x128xf32>
    %3 = vector.shape_cast %0 : vector<8x128xf32> to vector<1x8x128xf32>
    tpu.vector_store %arg2[%c0_1, %c0_2, %c0_3], %3 {strides = array<i32>} : memref<9x8x128xf32, #tpu.memory_space<vmem>>, vector<1x8x128xf32>,
    %cst = arith.constant 1.000000e+00 : f32
    %4 = vector.broadcast %cst : f32 to vector<8x128xf32>
    %5 = arith.mulf %0, %4 : vector<8x128xf32>
    %6 = math.sin %5 : vector<8x128xf32>
    %c1 = arith.constant 1 : index
    %c0_4 = arith.constant 0 : index
    %c0_5 = arith.constant 0 : index
    %7 = vector.load %arg2[%c1, %c0_4, %c0_5] : memref<9x8x128xf32, #tpu.memory_space<vmem>>, vector<1x8x128xf32>
    %8 = vector.shape_cast %7 : vector<1x8x128xf32> to vector<8x128xf32>
    %9 = vector.shape_cast %6 : vector<8x128xf32> to vector<1x8x128xf32>
    tpu.vector_store %arg2[%c1, %c0_4, %c0_5], %9 {strides = array<i32>} : memref<9x8x128xf32, #tpu.memory_space<vmem>>, vector<1x8x128xf32>,
    %10 = math.cos %5 : vector<8x128xf32>
    %c2 = arith.constant 2 : index
    %c0_6 = arith.constant 0 : index
    %c0_7 = arith.constant 0 : index
    %11 = vector.load %arg2[%c2, %c0_6, %c0_7] : memref<9x8x128xf32, #tpu.memory_space<vmem>>, vector<1x8x128xf32>
    %12 = vector.shape_cast %11 : vector<1x8x128xf32> to vector<8x128xf32>
    %13 = vector.shape_cast %10 : vector<8x128xf32> to vector<1x8x128xf32>
    tpu.vector_store %arg2[%c2, %c0_6, %c0_7], %13 {strides = array<i32>} : memref<9x8x128xf32, #tpu.memory_space<vmem>>, vector<1x8x128xf32>,
    %cst_8 = arith.constant 3.33333325 : f32
    %14 = vector.broadcast %cst_8 : f32 to vector<8x128xf32>
    %15 = arith.mulf %0, %14 : vector<8x128xf32>
    %16 = math.sin %15 : vector<8x128xf32>
    %c3 = arith.constant 3 : index
    %c0_9 = arith.constant 0 : index
    %c0_10 = arith.constant 0 : index
    %17 = vector.load %arg2[%c3, %c0_9, %c0_10] : memref<9x8x128xf32, #tpu.memory_space<vmem>>, vector<1x8x128xf32>
    %18 = vector.shape_cast %17 : vector<1x8x128xf32> to vector<8x128xf32>
    %19 = vector.shape_cast %16 : vector<8x128xf32> to vector<1x8x128xf32>
    tpu.vector_store %arg2[%c3, %c0_9, %c0_10], %19 {strides = array<i32>} : memref<9x8x128xf32, #tpu.memory_space<vmem>>, vector<1x8x128xf32>,
    %20 = math.cos %15 : vector<8x128xf32>
    %c4 = arith.constant 4 : index
    %c0_11 = arith.constant 0 : index
    %c0_12 = arith.constant 0 : index
    %21 = vector.load %arg2[%c4, %c0_11, %c0_12] : memref<9x8x128xf32, #tpu.memory_space<vmem>>, vector<1x8x128xf32>
    %22 = vector.shape_cast %21 : vector<1x8x128xf32> to vector<8x128xf32>
    %23 = vector.shape_cast %20 : vector<8x128xf32> to vector<1x8x128xf32>
    tpu.vector_store %arg2[%c4, %c0_11, %c0_12], %23 {strides = array<i32>} : memref<9x8x128xf32, #tpu.memory_space<vmem>>, vector<1x8x128xf32>,
    %cst_13 = arith.constant 5.66666651 : f32
    %24 = vector.broadcast %cst_13 : f32 to vector<8x128xf32>
    %25 = arith.mulf %0, %24 : vector<8x128xf32>
    %26 = math.sin %25 : vector<8x128xf32>
    %c5 = arith.constant 5 : index
    %c0_14 = arith.constant 0 : index
    %c0_15 = arith.constant 0 : index
    %27 = vector.load %arg2[%c5, %c0_14, %c0_15] : memref<9x8x128xf32, #tpu.memory_space<vmem>>, vector<1x8x128xf32>
    %28 = vector.shape_cast %27 : vector<1x8x128xf32> to vector<8x128xf32>
    %29 = vector.shape_cast %26 : vector<8x128xf32> to vector<1x8x128xf32>
    tpu.vector_store %arg2[%c5, %c0_14, %c0_15], %29 {strides = array<i32>} : memref<9x8x128xf32, #tpu.memory_space<vmem>>, vector<1x8x128xf32>,
    %30 = math.cos %25 : vector<8x128xf32>
    %c6 = arith.constant 6 : index
    %c0_16 = arith.constant 0 : index
    %c0_17 = arith.constant 0 : index
    %31 = vector.load %arg2[%c6, %c0_16, %c0_17] : memref<9x8x128xf32, #tpu.memory_space<vmem>>, vector<1x8x128xf32>
    %32 = vector.shape_cast %31 : vector<1x8x128xf32> to vector<8x128xf32>
    %33 = vector.shape_cast %30 : vector<8x128xf32> to vector<1x8x128xf32>
    tpu.vector_store %arg2[%c6, %c0_16, %c0_17], %33 {strides = array<i32>} : memref<9x8x128xf32, #tpu.memory_space<vmem>>, vector<1x8x128xf32>,
    %cst_18 = arith.constant 8.000000e+00 : f32
    %34 = vector.broadcast %cst_18 : f32 to vector<8x128xf32>
    %35 = arith.mulf %0, %34 : vector<8x128xf32>
    %36 = math.sin %35 : vector<8x128xf32>
    %c7 = arith.constant 7 : index
    %c0_19 = arith.constant 0 : index
    %c0_20 = arith.constant 0 : index
    %37 = vector.load %arg2[%c7, %c0_19, %c0_20] : memref<9x8x128xf32, #tpu.memory_space<vmem>>, vector<1x8x128xf32>
    %38 = vector.shape_cast %37 : vector<1x8x128xf32> to vector<8x128xf32>
    %39 = vector.shape_cast %36 : vector<8x128xf32> to vector<1x8x128xf32>
    tpu.vector_store %arg2[%c7, %c0_19, %c0_20], %39 {strides = array<i32>} : memref<9x8x128xf32, #tpu.memory_space<vmem>>, vector<1x8x128xf32>,
    %40 = math.cos %35 : vector<8x128xf32>
    %c8 = arith.constant 8 : index
    %c0_21 = arith.constant 0 : index
    %c0_22 = arith.constant 0 : index
    %41 = vector.load %arg2[%c8, %c0_21, %c0_22] : memref<9x8x128xf32, #tpu.memory_space<vmem>>, vector<1x8x128xf32>
    %42 = vector.shape_cast %41 : vector<1x8x128xf32> to vector<8x128xf32>
    %43 = vector.shape_cast %40 : vector<8x128xf32> to vector<1x8x128xf32>
    tpu.vector_store %arg2[%c8, %c0_21, %c0_22], %43 {strides = array<i32>} : memref<9x8x128xf32, #tpu.memory_space<vmem>>, vector<1x8x128xf32>,
    return
  }
  func.func @transform_0(%arg0: i32) -> (i32, i32) {
    %c0_i32 = arith.constant 0 : i32
    %c0_i32_0 = arith.constant 0 : i32
    return %arg0, %c0_i32 : i32, i32
  }
  func.func @transform_1(%arg0: i32) -> (i32, i32, i32) {
    %c0_i32 = arith.constant 0 : i32
    %c0_i32_0 = arith.constant 0 : i32
    %c0_i32_1 = arith.constant 0 : i32
    return %c0_i32, %arg0, %c0_i32_0 : i32, i32, i32
  }
}

</mosaic_0001>

<bundles_post_ra>
// kernel: tpu_custom_call.1
= control target key start
LH: loop header
LB: loop body
LE: loop exit
PB: predicated region body
PF: predicated region fallthrough
CT: control target
= control target key end

     0   :  { %6 = vsyncpa [#allocation3], 0  ;;  %s1369_s0 = inlined_call_operand.hbm [shape: f32[8,128], index: 0, kind: input, shape index: {}]   ;;  %s1370_s1 = inlined_call_operand.hbm [shape: f32[9,8,128], index: 1, kind: output, shape index: {}]  }
   0x1   :  { %7 = vsyncpa [#allocation4], 0  ;;  %s1009_s6 = smov [#allocation2]   ;;  %s961_s10 = scalar_lea.hbm %s1369_s0, 128 }
   0x2   :  { %s14_s7 = sshll.u32 %s1009_s6, 4  ;;  %p962_p0 = scmp.ne.s32.totalorder %s1369_s0, %s961_s10  ;;  %s15_s7 = int_to_ptr.vmem [resolvable:$true] %s14_s7 }
   0x3   :  { %p965_p1 = scmp.lt.u32.totalorder %s961_s10, %s1369_s0 }
   0x5   :  { %p967_p2 = pnand %p965_p1, %p962_p0 }
   0x7   :  { %970 = shalt.err (!%p967_p2)
}
   0x8   :  { %s971_s15 = scalar_lea.vmem %s15_s7, 128  ;;  %p976_p4 = scmp.lt.s32.totalorder %s15_s7, %s15_s7 }
   0x9   :  { %p972_p3 = scmp.ne.s32.totalorder %s15_s7, %s971_s15  ;;  %p977_p5 = scmp.lt.s32.totalorder %s971_s15, %s971_s15 }
   0xb   :  { %p978_p6 = por %p977_p5, %p976_p4 }
   0xd   :  { %p979_p7 = pnand %p978_p6, %p972_p3 }
   0xf   :  { %982 = shalt.err (!%p979_p7)
}
  0x10   :  { %17 = dma.hbm_to_vmem [thread:$0]  %s1369_s0, 128, %s15_s7, [#allocation3]  }
  0x11   :  { %1005 = dma.done.wait [#allocation3], 128  }
  0x12   :  { %1006 = vsyncadd [#allocation3], 4294967168  ;;  %v1041_v0 = vld [vmem:[#allocation2] sm:$0xff]  ;;  %v1010_v26 = vmov 683565275   ;;  %s1016_s0 = smov [#allocation5]  }
  0x13   :  { %22 = vst [vmem:[#allocation5] sm:$0xff] %v1041_v0  ;;  %v23_v1 = vand.u32 2147483647, %v1041_v0  ;;  %v26_v2 = vand.u32 2139095040, %v1041_v0  ;;  %v1047_v3 = vmul.f32 3.3333333, %v1041_v0 }
  0x14   :  { %v1050_v4 = vmul.f32 5.6666665, %v1041_v0  ;;  %v1011_v28 = vmov 2475754826   ;;  %v1012_v30 = vmov 2131351028  }
  0x15   :  { %v27_v5 = vshrl.u32 %v26_v2, 23  ;;  %v30_v6 = vand.u32 8388607, %v23_v1  ;;  %v235_v7 = vand.u32 2147483647, %v1047_v3  ;;  %v238_v8 = vand.u32 2139095040, %v1047_v3 }
  0x16   :  { %v450_v12 = vand.u32 2139095040, %v1050_v4  ;;  %v1013_v32 = vmov 2102212464   ;;  %v1014_v34 = vmov 920167782   ;;  %vm25_vm13 = vcmp.lt.s32.totalorder %v1041_v0, 0 }
  0x17   :  { %v887_v9 = vadd.s32 4294967169, %v27_v5  ;;  %v239_v10 = vshrl.u32 %v238_v8, 23  ;;  %v242_v11 = vand.u32 8388607, %v235_v7  ;;  %v31_v14 = vor.u32 8388608, %v30_v6  ;;  %s875_s18 = sshll.u32 %s1016_s0, 4  ;;  %s876_s18 = int_to_ptr.vmem [resolvable:$true] %s875_s18 }
  0x18   :  { %v451_v17 = vshrl.u32 %v450_v12, 23  ;;  %v1015_v41 = vmov 1326507024   ;;  %vm1159_vm14 = vcmp.le.f32.partialorder %v23_v1, 0.7853982  ;;  %s983_s19 = scalar_lea.vmem %s876_s18, 1152  ;;  %p988_p9 = scmp.lt.s32.totalorder %s876_s18, %s876_s18 }
  0x19   :  { %v33_v13 = vadd.s32 1, %v887_v9  ;;  %v895_v15 = vadd.s32 4294967169, %v239_v10  ;;  %v243_v16 = vor.u32 8388608, %v242_v11  ;;  %v1059_v22 = vshll.u32 %v31_v14, 8  ;;  %p984_p8 = scmp.ne.s32.totalorder %s876_s18, %s983_s19  ;;  %p989_p10 = scmp.lt.s32.totalorder %s983_s19, %s983_s19 }
  0x1a   :  { %v1063_v24 = vadd.s32 4294967169, %v451_v17 }
  0x1b   :  { %vm34_vm0 = vcmp.gt.s32.totalorder %v33_v13, 0  ;;  %v245_v19 = vadd.s32 1, %v895_v15  ;;  %v1061_v23 = vshll.u32 %v243_v16, 8  ;;  %p990_p11 = por %p989_p10, %p988_p9 }
  0x1c   :  { %v35_v18 = vsel %vm34_vm0, %v33_v13, 0 }
  0x1d   :  { %v36_v20 = vshrl.u32 %v35_v18, 5  ;;  %v37_v21 = vand.u32 31, %v35_v18  ;;  %vm246_vm1 = vcmp.gt.s32.totalorder %v245_v19, 0  ;;  %p991_p12 = pnand %p990_p11, %p984_p8 }
  0x1e   :  { %v247_v46 = vsel %vm246_vm1, %v245_v19, 0 }
  0x1f   :  { %v38_v25 = vsub.s32 32, %v37_v21  ;;  %v40_v27 = vshll.u32 %v1010_v26, %v37_v21  ;;  %v43_v29 = vshll.u32 %v1011_v28, %v37_v21  ;;  %v46_v31 = vshll.u32 %v1012_v30, %v37_v21 }
  0x20   :  { %v49_v33 = vshll.u32 %v1013_v32, %v37_v21  ;;  %v52_v35 = vshll.u32 %v1014_v34, %v37_v21  ;;  %vm55_vm2 = vcmp.lt.s32.totalorder %v36_v20, 1  ;;  %vm56_vm3 = vcmp.lt.s32.totalorder %v36_v20, 2 }
  0x21   :  { %v39_v36 = vshrl.u32 %v1010_v26, %v38_v25  ;;  %v41_v37 = vshrl.u32 %v1011_v28, %v38_v25  ;;  %v44_v38 = vshrl.u32 %v1012_v30, %v38_v25  ;;  %v47_v39 = vshrl.u32 %v1013_v32, %v38_v25 }
  0x22   :  { %v50_v40 = vshrl.u32 %v1014_v34, %v38_v25  ;;  %v53_v42 = vshrl.u32 %v1015_v41, %v38_v25  ;;  %vm57_vm4 = vcmp.lt.s32.totalorder %v36_v20, 3  ;;  %vm58_vm5 = vcmp.lt.s32.totalorder %v36_v20, 4 }
  0x23   :  { %v42_v43 = vor.u32 %v41_v37, %v40_v27  ;;  %v45_v44 = vor.u32 %v44_v38, %v43_v29  ;;  %v48_v45 = vor.u32 %v47_v39, %v46_v31  ;;  %v248_v49 = vshrl.u32 %v247_v46, 5 }
  0x24   :  { %v51_v47 = vor.u32 %v50_v40, %v49_v33  ;;  %v54_v48 = vor.u32 %v53_v42, %v52_v35  ;;  %v249_v50 = vand.u32 31, %v247_v46  ;;  %v457_v29 = vadd.s32 1, %v1063_v24 }
  0x25   :  { %v59_v51 = vsel %vm55_vm2, %v39_v36, %v42_v43  ;;  %v60_v52 = vsel %vm58_vm5, %v48_v45, 2102212464  ;;  %v63_v53 = vsel %vm55_vm2, %v42_v43, %v45_v44  ;;  %v67_v54 = vsel %vm55_vm2, %v45_v44, %v48_v45 }
  0x26   :  { %v61_v55 = vsel %vm57_vm4, %v45_v44, %v60_v52  ;;  %v64_v56 = vsel %vm58_vm5, %v51_v47, 920167782  ;;  %v68_v57 = vsel %vm58_vm5, %v54_v48, 1326507024  ;;  %v250_v58 = vsub.s32 32, %v249_v50 }
  0x27   :  { %v62_v59 = vsel %vm56_vm3, %v59_v51, %v61_v55  ;;  %v65_v60 = vsel %vm57_vm4, %v48_v45, %v64_v56  ;;  %v69_v61 = vsel %vm57_vm4, %v51_v47, %v68_v57  ;;  %v252_v62 = vshll.u32 %v1010_v26, %v249_v50 }
  0x28   :  { %v66_v63 = vsel %vm56_vm3, %v63_v53, %v65_v60  ;;  %v70_v2 = vsel %vm56_vm3, %v67_v54, %v69_v61  ;;  %v78_v5 = vmul.u32 %v1059_v22, %v62_v59  ;;  %v251_v6 = vshrl.u32 %v1010_v26, %v250_v58 }
  0x29   :  { %v1090_v8 = vmul.u32.u64.low %v1059_v22, %v70_v2  ;;  %v1091_v9 = vmul.u32.u64.high %v1059_v22, %v70_v2, %v1090_v8  ;;  %v1094_v10 = vmul.u32.u64.low %v1059_v22, %v66_v63  ;;  %v1095_v11 = vmul.u32.u64.high %v1059_v22, %v66_v63, %v1094_v10 }
  0x2a   :  { %v253_v12 = vshrl.u32 %v1011_v28, %v250_v58  ;;  %v255_v13 = vshll.u32 %v1011_v28, %v249_v50  ;;  %v256_v14 = vshrl.u32 %v1012_v30, %v250_v58  ;;  %v258_v15 = vshll.u32 %v1012_v30, %v249_v50 }
  0x2b   :  { %v259_v16 = vshrl.u32 %v1013_v32, %v250_v58  ;;  %v261_v17 = vshll.u32 %v1013_v32, %v249_v50  ;;  %v262_v18 = vshrl.u32 %v1014_v34, %v250_v58  ;;  %v264_v19 = vshll.u32 %v1014_v34, %v249_v50 }
  0x2c   :  { %v254_v20 = vor.u32 %v253_v12, %v252_v62  ;;  %v257_v21 = vor.u32 %v256_v14, %v255_v13  ;;  %v265_v22 = vshrl.u32 %v1015_v41, %v250_v58  ;;  %vm267_vm6 = vcmp.lt.s32.totalorder %v248_v49, 1 }
  0x2d   :  { %vm80_vm7 = vc.u32 %v1091_v9, %v1094_v10  ;;  %v81_v25 = vadd.s32 1, %v1095_v11  ;;  %v260_v27 = vor.u32 %v259_v16, %v258_v15  ;;  %v263_v31 = vor.u32 %v262_v18, %v261_v17 }
  0x2e   :  { %v266_v33 = vor.u32 %v265_v22, %v264_v19  ;;  %vm268_vm8 = vcmp.lt.s32.totalorder %v248_v49, 2  ;;  %vm269_vm9 = vcmp.lt.s32.totalorder %v248_v49, 3  ;;  %vm270_vm10 = vcmp.lt.s32.totalorder %v248_v49, 4 }
  0x2f   :  { %v82_v35 = vsel %vm80_vm7, %v81_v25, %v1095_v11  ;;  %v271_v36 = vsel %vm267_vm6, %v251_v6, %v254_v20  ;;  %v275_v37 = vsel %vm267_vm6, %v254_v20, %v257_v21  ;;  %v272_v39 = vsel %vm270_vm10, %v260_v27, 2102212464 }
  0x30   :  { %v83_v38 = vadd.s32 %v82_v35, %v78_v5  ;;  %v276_v40 = vsel %vm270_vm10, %v263_v31, 920167782  ;;  %v279_v42 = vsel %vm267_vm6, %v257_v21, %v260_v27  ;;  %v273_v43 = vsel %vm269_vm9, %v257_v21, %v272_v39 }
  0x31   :  { %v277_v44 = vsel %vm269_vm9, %v260_v27, %v276_v40  ;;  %v280_v45 = vsel %vm270_vm10, %v266_v33, 1326507024  ;;  %vm458_vm11 = vcmp.gt.s32.totalorder %v457_v29, 0  ;;  %v447_v48 = vand.u32 2147483647, %v1050_v4 }
  0x32   :  { %v84_v24 = vadd.s32 536870912, %v83_v38  ;;  %v278_v46 = vsel %vm268_vm8, %v275_v37, %v277_v44  ;;  %v281_v47 = vsel %vm269_vm9, %v263_v31, %v280_v45  ;;  %v274_v50 = vsel %vm268_vm8, %v271_v36, %v273_v43 }
  0x33   :  { %v282_v51 = vsel %vm268_vm8, %v279_v42, %v281_v47  ;;  %v1120_v52 = vmul.u32.u64.low %v1061_v23, %v278_v46  ;;  %v1121_v53 = vmul.u32.u64.high %v1061_v23, %v278_v46, %v1120_v52  ;;  %v459_v57 = vsel %vm458_vm11, %v457_v29, 0 }
  0x34   :  { %v85_v54 = vshrl.u32 %v84_v24, 30  ;;  %v1125_v55 = vmul.u32.u64.low %v1061_v23, %v282_v51  ;;  %v1126_v56 = vmul.u32.u64.high %v1061_v23, %v282_v51, %v1125_v55  ;;  %v461_v58 = vand.u32 31, %v459_v57 }
  0x35   :  { %v290_v60 = vmul.u32 %v1061_v23, %v274_v50  ;;  %v1130_v61 = vmul.f32 8.0, %v1041_v0  ;;  %v293_v49 = vadd.s32 1, %v1121_v53  ;;  %v454_v62 = vand.u32 8388607, %v447_v48 }
  0x36   :  { %v86_v59 = vshll.u32 %v85_v54, 30  ;;  %vm292_vm12 = vc.u32 %v1126_v56, %v1120_v52  ;;  %v462_v6 = vsub.s32 32, %v461_v58  ;;  %v109_v13 = vsub.s32 4, %v85_v54 }
  0x37   :  { %v659_v2 = vand.u32 2147483647, %v1130_v61  ;;  %v294_v5 = vsel %vm292_vm12, %v293_v49, %v1121_v53  ;;  %v455_v23 = vor.u32 8388608, %v454_v62  ;;  %v662_v14 = vand.u32 2139095040, %v1130_v61 }
  0x38   :  { %v87_v63 = vsub.s32 %v83_v38, %v86_v59  ;;  %v295_v11 = vadd.s32 %v294_v5, %v290_v60  ;;  %v464_v17 = vshll.u32 %v1010_v26, %v461_v58  ;;  %v465_v18 = vshrl.u32 %v1011_v28, %v462_v6 }
  0x39   :  { %v1142_v15 = vand.u32 8388607, %v659_v2  ;;  %v467_v19 = vshll.u32 %v1011_v28, %v461_v58  ;;  %v468_v21 = vshrl.u32 %v1012_v30, %v462_v6  ;;  %v470_v22 = vshll.u32 %v1012_v30, %v461_v58 }
  0x3a   :  { %v89_v8 = vsub.s32 0, %v87_v63  ;;  %v296_v16 = vadd.s32 536870912, %v295_v11  ;;  %v471_v25 = vshrl.u32 %v1013_v32, %v462_v6  ;;  %v79_v27 = vadd.s32 %v1094_v10, %v1091_v9 }
  0x3b   :  { %v1155_v31 = vshll.u32 %v455_v23, 8  ;;  %v460_v36 = vshrl.u32 %v459_v57, 5  ;;  %v473_v37 = vshll.u32 %v1013_v32, %v461_v58  ;;  %v474_v38 = vshrl.u32 %v1014_v34, %v462_v6 }
  0x3c   :  { %v888_v12 = vmin.u32 %v89_v8, %v87_v63  ;;  %v1153_v29 = vshrl.u32 %v296_v16, 30  ;;  %v110_v39 = vsel %vm25_vm13, %v109_v13, %v85_v54  ;;  %v663_v10 = vshrl.u32 %v662_v14, 23 }
  0x3d   :  { %v667_v40 = vor.u32 8388608, %v1142_v15  ;;  %v466_v42 = vor.u32 %v465_v18, %v464_v17  ;;  %v469_v1 = vor.u32 %v468_v21, %v467_v19  ;;  %v472_v43 = vor.u32 %v471_v25, %v470_v22 }
  0x3e   :  { %v91_v20 = vclz %v888_v12  ;;  %v298_v9 = vshll.u32 %v1153_v29, 30  ;;  %v476_v24 = vshll.u32 %v1014_v34, %v461_v58  ;;  %v477_v46 = vshrl.u32 %v1015_v41, %v462_v6 }
  0x3f   :  { %v475_v53 = vor.u32 %v474_v38, %v473_v37  ;;  %v463_v55 = vshrl.u32 %v1010_v26, %v462_v6  ;;  %vm479_vm0 = vcmp.lt.s32.totalorder %v460_v36, 1  ;;  %vm482_vm1 = vcmp.lt.s32.totalorder %v460_v36, 4 }
  0x40   :  { %v889_v35 = vadd.s32 4294967294, %v91_v20  ;;  %v1169_v45 = vsub.s32 %v295_v11, %v298_v9  ;;  %v291_v60 = vadd.s32 %v1120_v52, %v1126_v56  ;;  %v484_v49 = vsel %vm482_vm1, %v472_v43, 2102212464 }
  0x41   :  { %v478_v62 = vor.u32 %v477_v46, %v476_v24  ;;  %vm480_vm2 = vcmp.lt.s32.totalorder %v460_v36, 2  ;;  %vm481_vm3 = vcmp.lt.s32.totalorder %v460_v36, 3  ;;  %v487_v8 = vsel %vm479_vm0, %v466_v42, %v469_v1 }
  0x42   :  { %vm890_vm15 = vcmp.lt.s32.totalorder %v889_v35, 0  ;;  %v301_v54 = vsub.s32 0, %v1169_v45  ;;  %v488_v6 = vsel %vm482_vm1, %v475_v53, 920167782  ;;  %v112_v11 = vsel %vm1159_vm14, 0, %v110_v39 }
  0x43   :  { %v94_v44 = vsel %vm890_vm15, 0, %v889_v35  ;;  %vm237_vm4 = vcmp.lt.s32.totalorder %v1047_v3, 0  ;;  %v483_v52 = vsel %vm479_vm0, %v463_v55, %v466_v42  ;;  %v485_v56 = vsel %vm481_vm3, %v469_v1, %v484_v49 }
  0x44   :  { %v95_v47 = vsub.s32 32, %v94_v44  ;;  %v96_v50 = vshll.u32 %v87_v63, %v94_v44  ;;  %v99_v51 = vsub.s32 4294967266, %v94_v44  ;;  %v896_v58 = vmin.u32 %v301_v54, %v1169_v45 }
  0x45   :  { %v489_v14 = vsel %vm481_vm3, %v472_v43, %v488_v6  ;;  %v491_v16 = vsel %vm479_vm0, %v469_v1, %v472_v43  ;;  %v321_v18 = vsub.s32 4, %v1153_v29  ;;  %v492_v20 = vsel %vm482_vm1, %v478_v62, 1326507024 }
  0x46   :  { %v97_v57 = vshrl.u32 %v79_v27, %v95_v47  ;;  %v100_v59 = vadd.s32 127, %v99_v51  ;;  %v303_v23 = vclz %v896_v58  ;;  %v490_v19 = vsel %vm480_vm2, %v487_v8, %v489_v14 }
  0x47   :  { %vm1193_vm5 = vcmp.le.f32.partialorder %v235_v7, 0.7853982  ;;  %v493_v25 = vsel %vm481_vm3, %v475_v53, %v492_v20  ;;  %v1199_v27 = vmul.u32.u64.low %v1155_v31, %v490_v19  ;;  %v1200_v35 = vmul.u32.u64.high %v1155_v31, %v490_v19, %v1199_v27 }
  0x48   :  { %v98_v63 = vor.u32 %v97_v57, %v96_v50  ;;  %v101_v5 = vshll.u32 %v100_v59, 23  ;;  %v897_v17 = vadd.s32 4294967294, %v303_v23  ;;  %v486_v37 = vsel %vm480_vm2, %v483_v52, %v485_v56 }
  0x49   :  { %v494_v38 = vsel %vm480_vm2, %v491_v16, %v493_v25  ;;  %v911_v39 = vadd.s32 4294967169, %v663_v10  ;;  %v116_v50 = vadd.s32 3, %v112_v11  ;;  %v502_v51 = vmul.u32 %v1155_v31, %v486_v37 }
  0x4a   :  { %v102_v12 = vor.u32 4788187, %v101_v5  ;;  %v105_v13 = vcvt.s32.f32 %v98_v63  ;;  %vm898_vm6 = vcmp.lt.s32.totalorder %v897_v17, 0  ;;  %v505_v53 = vadd.s32 1, %v1200_v35 }
  0x4b   :  { %v306_v42 = vsel %vm898_vm6, 0, %v897_v17  ;;  %v1206_v7 = vmul.u32.u64.low %v1155_v31, %v494_v38  ;;  %v1207_v1 = vmul.u32.u64.high %v1155_v31, %v494_v38, %v1206_v7  ;;  %v669_v46 = vadd.s32 1, %v911_v39 }
  0x4c   :  { %v103_v21 = vand.u32 2147483647, %v102_v12  ;;  %v307_v43 = vsub.s32 32, %v306_v42  ;;  %v308_v44 = vshll.u32 %v1169_v45, %v306_v42  ;;  %v311_v24 = vsub.s32 4294967266, %v306_v42 }
  0x4d   :  { %v1212_v36 = vand.u32 3, %v112_v11  ;;  %vm670_vm7 = vcmp.gt.s32.totalorder %v669_v46, 0  ;;  %v322_v45 = vsel %vm237_vm4, %v321_v18, %v1153_v29  ;;  %vm504_vm8 = vc.u32 %v1207_v1, %v1199_v27 }
  0x4e   :  { %v106_v9 = vmul.f32 %v105_v13, %v103_v21  ;;  %v309_v10 = vshrl.u32 %v291_v60, %v307_v43  ;;  %v312_v54 = vadd.s32 127, %v311_v24  ;;  %v671_v57 = vsel %vm670_vm7, %v669_v46, 0 }
  0x4f   :  { %v506_v60 = vsel %vm504_vm8, %v505_v53, %v1200_v35  ;;  %v1225_v58 = vand.u32 3, %v116_v50  ;;  %v673_v63 = vand.u32 31, %v671_v57  ;;  %v324_v8 = vsel %vm1193_vm5, 0, %v322_v45 }
  0x50   :  { %v107_v47 = vxor.u32 2147483648, %v106_v9  ;;  %v310_v59 = vor.u32 %v309_v10, %v308_v44  ;;  %v313_v49 = vshll.u32 %v312_v54, 23  ;;  %v507_v62 = vadd.s32 %v506_v60, %v502_v51 }
  0x51   :  { %v674_v11 = vsub.s32 32, %v673_v63  ;;  %v676_v33 = vshll.u32 %v1010_v26, %v673_v63  ;;  %v679_v23 = vshll.u32 %v1011_v28, %v673_v63  ;;  %v682_v56 = vshll.u32 %v1012_v30, %v673_v63 }
  0x52   :  { %v108_v55 = vsel %vm25_vm13, %v107_v47, %v106_v9  ;;  %v314_v5 = vor.u32 4788187, %v313_v49  ;;  %v317_v29 = vcvt.s32.f32 %v310_v59  ;;  %v508_v6 = vadd.s32 536870912, %v507_v62 }
  0x53   :  { %v111_v31 = vsel %vm1159_vm14, %v1041_v0, %v108_v55  ;;  %v685_v12 = vshll.u32 %v1013_v32, %v673_v63  ;;  %v1234_v13 = vshll.u32 %v1014_v34, %v673_v63  ;;  %v1238_v16 = vshrl.u32 %v671_v57, 5 }
  0x54   :  { %945 = vcosq.f32 %v111_v31  ;;  %v315_v52 = vand.u32 2147483647, %v314_v5  ;;  %v1236_v14 = vshrl.u32 %v508_v6, 30  ;;  %v677_v17 = vshrl.u32 %v1011_v28, %v674_v11 }
  0x55   :  { %947 = vsinq.f32 %v111_v31  ;;  %v680_v18 = vshrl.u32 %v1012_v30, %v674_v11  ;;  %vm115_vm9 = vweird.f32 %v1041_v0  ;;  %v683_v20 = vshrl.u32 %v1013_v32, %v674_v11 }
  0x56   :  { %v318_v19 = vmul.f32 %v317_v29, %v315_v52  ;;  %v686_v21 = vshrl.u32 %v1014_v34, %v674_v11  ;;  %v689_v25 = vshrl.u32 %v1015_v41, %v674_v11  ;;  %v510_v35 = vshll.u32 %v1236_v14, 30 }
  0x57   :  { %v675_v37 = vshrl.u32 %v1010_v26, %v674_v11  ;;  %v678_v38 = vor.u32 %v677_v17, %v676_v33  ;;  %v681_v39 = vor.u32 %v680_v18, %v679_v23  ;;  %v684_v42 = vor.u32 %v683_v20, %v682_v56 }
  0x58   :  { %v319_v9 = vxor.u32 2147483648, %v318_v19  ;;  %v687_v28 = vor.u32 %v686_v21, %v685_v12  ;;  %v690_v30 = vor.u32 %v689_v25, %v1234_v13  ;;  %vm223_vm10 = vcmp.lt.s32.totalorder %v1212_v36, 2 }
  0x59   :  { %vm224_vm11 = vcmp.eq.s32.totalorder %v1212_v36, 0  ;;  %v328_v32 = vadd.s32 3, %v324_v8  ;;  %v1251_v7 = vsub.s32 %v507_v62, %v510_v35  ;;  %vm118_vm12 = vcmp.lt.s32.totalorder %v1225_v58, 2 }
  0x5a   :  { %vm227_vm13 = vcmp.eq.s32.totalorder %v1212_v36, 2  ;;  %v320_v26 = vsel %vm237_vm4, %v319_v9, %v318_v19  ;;  %v1257_v34 = vand.u32 3, %v324_v8  ;;  %vm122_vm14 = vcmp.eq.s32.totalorder %v1225_v58, 2 }
  0x5b   :  { %v323_v43 = vsel %vm1193_vm5, %v1047_v3, %v320_v26  ;;  %v513_v44 = vsub.s32 0, %v1251_v7  ;;  %vm691_vm15 = vcmp.lt.s32.totalorder %v1238_v16, 1  ;;  %vm119_vm0 = vcmp.eq.s32.totalorder %v1225_v58, 0 }
  0x5c   :  { %949 = vcosq.f32 %v323_v43  ;;  %v695_v47 = vsel %vm691_vm15, %v675_v37, %v678_v38  ;;  %v1268_v51 = vand.u32 3, %v328_v32  ;;  %vm439_vm1 = vcmp.eq.s32.totalorder %v1257_v34, 2 }
  0x5d   :  { %951 = vsinq.f32 %v323_v43  ;;  %v904_v53 = vmin.u32 %v513_v44, %v1251_v7  ;;  %vm694_vm2 = vcmp.lt.s32.totalorder %v1238_v16, 4  ;;  %v1277_v54 = vshll.u32 %v667_v40, 8 }
  0x5e   :  { %v946_v41 = vpop.eup %945  ;;  %vm436_vm3 = vcmp.eq.s32.totalorder %v1257_v34, 0  ;;  %v696_v31 = vsel %vm694_vm2, %v684_v42, 2102212464  ;;  %v503_v15 = vadd.s32 %v1199_v27, %v1207_v1  ;;  %vm693_vm4 = vcmp.lt.s32.totalorder %v1238_v16, 3 }
  0x5f   :  { %v948_v24 = vpop.eup %947  ;;  %v123_v46 = vxor.u32 2147483648, %v946_v41  ;;  %v515_v57 = vclz %v904_v53  ;;  %vm327_vm5 = vweird.f32 %v1047_v3  ;;  %vm692_vm6 = vcmp.lt.s32.totalorder %v1238_v16, 2 }
  0x60   :  { %v120_v50 = vxor.u32 2147483648, %v948_v24  ;;  %v697_v36 = vsel %vm693_vm4, %v681_v39, %v696_v31  ;;  %v699_v27 = vsel %vm691_vm15, %v678_v38, %v681_v39  ;;  %v700_v1 = vsel %vm694_vm2, %v687_v28, 920167782 }
  0x61   :  { %v124_v22 = vsel %vm122_vm14, %v123_v46, %v948_v24  ;;  %v229_v10 = vsel %vm227_vm13, %v123_v46, %v948_v24  ;;  %v905_v62 = vadd.s32 4294967294, %v515_v57  ;;  %v703_v0 = vsel %vm691_vm15, %v681_v39, %v684_v42 }
  0x62   :  { %v121_v55 = vsel %vm119_vm0, %v946_v41, %v120_v50  ;;  %v226_v45 = vsel %vm224_vm11, %v946_v41, %v120_v50  ;;  %v698_v58 = vsel %vm692_vm6, %v695_v47, %v697_v36  ;;  %v701_v63 = vsel %vm693_vm4, %v684_v42, %v700_v1 }
  0x63   :  { %v125_v59 = vsel %vm118_vm12, %v121_v55, %v124_v22  ;;  %v230_v49 = vsel %vm223_vm10, %v226_v45, %v229_v10  ;;  %vm906_vm7 = vcmp.lt.s32.totalorder %v905_v62, 0  ;;  %v704_v5 = vsel %vm694_vm2, %v690_v30, 1326507024 }
  0x64   :  { %v126_v40 = vsel %vm115_vm9, nan, %v125_v59  ;;  %v231_v60 = vsel %vm115_vm9, nan, %v230_v49  ;;  %vm334_vm8 = vcmp.eq.s32.totalorder %v1268_v51, 2  ;;  %v518_v29 = vsel %vm906_vm7, 0, %v905_v62 }
  0x65   :  { %128 = vst [vmem:[#allocation5 + $0x8] sm:$0xff] %v126_v40  ;;  %233 = vst [vmem:[#allocation5 + $0x10] sm:$0xff] %v231_v60  ;;  %v702_v8 = vsel %vm692_vm6, %v699_v27, %v701_v63  ;;  %v705_v6 = vsel %vm693_vm4, %v687_v28, %v704_v5  ;;  %v519_v11 = vsub.s32 32, %v518_v29  ;;  %v520_v33 = vshll.u32 %v1251_v7, %v518_v29 }
  0x66   :  { %v523_v23 = vsub.s32 4294967266, %v518_v29  ;;  %v706_v52 = vsel %vm692_vm6, %v703_v0, %v705_v6  ;;  %v950_v56 = vpop.eup %949  ;;  %v1324_v17 = vmul.u32.u64.low %v1277_v54, %v702_v8  ;;  %v1325_v18 = vmul.u32.u64.high %v1277_v54, %v702_v8, %v1324_v17 }
  0x67   :  { %v1320_v12 = vmul.u32.u64.low %v1277_v54, %v706_v52  ;;  %v1321_v13 = vmul.u32.u64.high %v1277_v54, %v706_v52, %v1320_v12  ;;  %v952_v19 = vpop.eup %951  ;;  %vm331_vm9 = vcmp.eq.s32.totalorder %v1268_v51, 0  ;;  %v335_v20 = vxor.u32 2147483648, %v950_v56 }
  0x68   :  { %v521_v21 = vshrl.u32 %v503_v15, %v519_v11  ;;  %v524_v25 = vadd.s32 127, %v523_v23  ;;  %vm330_vm10 = vcmp.lt.s32.totalorder %v1268_v51, 2  ;;  %v332_v35 = vxor.u32 2147483648, %v952_v19 }
  0x69   :  { %vm435_vm11 = vcmp.lt.s32.totalorder %v1257_v34, 2  ;;  %v714_v16 = vmul.u32 %v1277_v54, %v698_v58  ;;  %v336_v37 = vsel %vm334_vm8, %v335_v20, %v952_v19  ;;  %v441_v38 = vsel %vm439_vm1, %v335_v20, %v952_v19 }
  0x6a   :  { %v522_v39 = vor.u32 %v521_v21, %v520_v33  ;;  %v525_v9 = vshll.u32 %v524_v25, 23  ;;  %v333_v42 = vsel %vm331_vm9, %v950_v56, %v332_v35  ;;  %v438_v28 = vsel %vm436_vm3, %v950_v56, %v332_v35 }
  0x6b   :  { %v715_v30 = vadd.s32 %v1324_v17, %v1321_v13  ;;  %vm716_vm12 = vc.u32 %v1321_v13, %v1324_v17  ;;  %v337_v32 = vsel %vm330_vm10, %v333_v42, %v336_v37  ;;  %v442_v7 = vsel %vm435_vm11, %v438_v28, %v441_v38 }
  0x6c   :  { %v526_v26 = vor.u32 4788187, %v525_v9  ;;  %v529_v41 = vcvt.s32.f32 %v522_v39  ;;  %v338_v43 = vsel %vm327_vm5, nan, %v337_v32  ;;  %v443_v44 = vsel %vm327_vm5, nan, %v442_v7 }
  0x6d   :  { %v717_v24 = vadd.s32 1, %v1325_v18  ;;  %340 = vst [vmem:[#allocation5 + $0x18] sm:$0xff] %v338_v43  ;;  %445 = vst [vmem:[#allocation5 + $0x20] sm:$0xff] %v443_v44  ;;  %v533_v46 = vsub.s32 4, %v1236_v14  ;;  %vm449_vm13 = vcmp.lt.s32.totalorder %v1050_v4, 0  ;;  %vm539_vm6 = vweird.f32 %v1050_v4 }
  0x6e   :  { %v527_v34 = vand.u32 2147483647, %v526_v26  ;;  %vm448_vm14 = vcmp.le.f32.partialorder %v447_v48, 0.7853982  ;;  %vm661_vm7 = vcmp.lt.s32.totalorder %v1130_v61, 0 }
  0x6f   :  { %v718_v47 = vsel %vm716_vm12, %v717_v24, %v1325_v18  ;;  %v534_v3 = vsel %vm449_vm13, %v533_v46, %v1236_v14  ;;  %vm660_vm8 = vcmp.le.f32.partialorder %v659_v2, 0.7853982 }
  0x70   :  { %v530_v50 = vmul.f32 %v529_v41, %v527_v34  ;;  %v719_v51 = vadd.s32 %v718_v47, %v714_v16  ;;  %v536_v45 = vsel %vm448_vm14, 0, %v534_v3 }
  0x71   :  { %v540_v31 = vadd.s32 3, %v536_v45  ;;  %v646_v40 = vand.u32 3, %v536_v45 }
  0x72   :  { %v531_v53 = vxor.u32 2147483648, %v530_v50  ;;  %v720_v22 = vadd.s32 536870912, %v719_v51 }
  0x73   :  { %v541_v15 = vand.u32 3, %v540_v31  ;;  %vm651_vm0 = vcmp.eq.s32.totalorder %v646_v40, 2  ;;  %vm648_vm2 = vcmp.eq.s32.totalorder %v646_v40, 0  ;;  %vm647_vm4 = vcmp.lt.s32.totalorder %v646_v40, 2 }
  0x74   :  { %v532_v10 = vsel %vm449_vm13, %v531_v53, %v530_v50  ;;  %v721_v54 = vshrl.u32 %v720_v22, 30 }
  0x75   :  { %v535_v55 = vsel %vm448_vm14, %v1050_v4, %v532_v10  ;;  %vm546_vm15 = vcmp.eq.s32.totalorder %v541_v15, 2  ;;  %vm543_vm1 = vcmp.eq.s32.totalorder %v541_v15, 0  ;;  %vm542_vm3 = vcmp.lt.s32.totalorder %v541_v15, 2 }
  0x76   :  { %953 = vcosq.f32 %v535_v55  ;;  %v722_v57 = vshll.u32 %v721_v54, 30  ;;  %v745_v21 = vsub.s32 4, %v721_v54 }
  0x77   :  { %955 = vsinq.f32 %v535_v55 }
  0x78   :  { %v723_v59 = vsub.s32 %v719_v51, %v722_v57  ;;  %v746_v16 = vsel %vm661_vm7, %v745_v21, %v721_v54 }
  0x79   :  { %v748_v39 = vsel %vm660_vm8, 0, %v746_v16 }
  0x7a   :  { %v725_v49 = vsub.s32 0, %v723_v59  ;;  %v752_v9 = vadd.s32 3, %v748_v39  ;;  %v858_v28 = vand.u32 3, %v748_v39 }
  0x7c   :  { %v912_v60 = vmin.u32 %v725_v49, %v723_v59  ;;  %v753_v42 = vand.u32 3, %v752_v9  ;;  %vm863_vm10 = vcmp.eq.s32.totalorder %v858_v28, 2  ;;  %vm860_vm12 = vcmp.eq.s32.totalorder %v858_v28, 0 }
  0x7d   :  { %vm859_vm14 = vcmp.lt.s32.totalorder %v858_v28, 2 }
  0x7e   :  { %v727_v62 = vclz %v912_v60  ;;  %vm758_vm9 = vcmp.eq.s32.totalorder %v753_v42, 2  ;;  %vm755_vm11 = vcmp.eq.s32.totalorder %v753_v42, 0  ;;  %vm754_vm13 = vcmp.lt.s32.totalorder %v753_v42, 2 }
  0x80   :  { %v954_v48 = vpop.eup %953  ;;  %v913_v14 = vadd.s32 4294967294, %v727_v62 }
  0x81   :  { %v956_v36 = vpop.eup %955  ;;  %v547_v27 = vxor.u32 2147483648, %v954_v48 }
  0x82   :  { %v544_v1 = vxor.u32 2147483648, %v956_v36  ;;  %vm914_vm5 = vcmp.lt.s32.totalorder %v913_v14, 0 }
  0x83   :  { %v548_v0 = vsel %vm546_vm15, %v547_v27, %v956_v36  ;;  %v653_v58 = vsel %vm651_vm0, %v547_v27, %v956_v36  ;;  %v730_v63 = vsel %vm914_vm5, 0, %v913_v14  ;;  %vm751_vm15 = vweird.f32 %v1130_v61 }
  0x84   :  { %v545_v5 = vsel %vm543_vm1, %v954_v48, %v544_v1  ;;  %v650_v29 = vsel %vm648_vm2, %v954_v48, %v544_v1  ;;  %v731_v8 = vsub.s32 32, %v730_v63  ;;  %v732_v6 = vshll.u32 %v723_v59, %v730_v63 }
  0x85   :  { %v549_v11 = vsel %vm542_vm3, %v545_v5, %v548_v0  ;;  %v654_v33 = vsel %vm647_vm4, %v650_v29, %v653_v58  ;;  %v735_v23 = vsub.s32 4294967266, %v730_v63 }
  0x86   :  { %v550_v52 = vsel %vm539_vm6, nan, %v549_v11  ;;  %v655_v56 = vsel %vm539_vm6, nan, %v654_v33  ;;  %v733_v12 = vshrl.u32 %v715_v30, %v731_v8 }
  0x87   :  { %552 = vst [vmem:[#allocation5 + $0x28] sm:$0xff] %v550_v52  ;;  %657 = vst [vmem:[#allocation5 + $0x30] sm:$0xff] %v655_v56  ;;  %v736_v13 = vadd.s32 127, %v735_v23 }
  0x88   :  { %v734_v17 = vor.u32 %v733_v12, %v732_v6 }
  0x89   :  { %v737_v18 = vshll.u32 %v736_v13, 23 }
  0x8a   :  { %v741_v4 = vcvt.s32.f32 %v734_v17 }
  0x8b   :  { %v738_v19 = vor.u32 4788187, %v737_v18 }
  0x8d   :  { %v739_v20 = vand.u32 2147483647, %v738_v19 }
  0x8f   :  { %v742_v25 = vmul.f32 %v741_v4, %v739_v20 }
  0x91   :  { %v743_v35 = vxor.u32 2147483648, %v742_v25 }
  0x93   :  { %v744_v37 = vsel %vm661_vm7, %v743_v35, %v742_v25 }
  0x94   :  { %v747_v38 = vsel %vm660_vm8, %v1130_v61, %v744_v37 }
  0x95   :  { %957 = vcosq.f32 %v747_v38 }
  0x96   :  { %959 = vsinq.f32 %v747_v38 }
  0x9f   :  { %v958_v30 = vpop.eup %957 }
  0xa0   :  { %v960_v32 = vpop.eup %959  ;;  %v759_v7 = vxor.u32 2147483648, %v958_v30 }
  0xa1   :  { %v756_v2 = vxor.u32 2147483648, %v960_v32 }
  0xa2   :  { %v760_v26 = vsel %vm758_vm9, %v759_v7, %v960_v32  ;;  %v865_v41 = vsel %vm863_vm10, %v759_v7, %v960_v32 }
  0xa3   :  { %v757_v43 = vsel %vm755_vm11, %v958_v30, %v756_v2  ;;  %v862_v44 = vsel %vm860_vm12, %v958_v30, %v756_v2 }
  0xa4   :  { %v761_v24 = vsel %vm754_vm13, %v757_v43, %v760_v26  ;;  %v866_v34 = vsel %vm859_vm14, %v862_v44, %v865_v41 }
  0xa5   :  { %v762_v46 = vsel %vm751_vm15, nan, %v761_v24  ;;  %v867_v47 = vsel %vm751_vm15, nan, %v866_v34 }
  0xa6   :  { %764 = vst [vmem:[#allocation5 + $0x38] sm:$0xff] %v762_v46  ;;  %869 = vst [vmem:[#allocation5 + $0x40] sm:$0xff] %v867_v47 }
  0xa7   :  { %994 = shalt.err (!%p991_p12)
}
  0xa8   :  { %s995_s22 = scalar_lea.hbm %s1370_s1, 1152 }
  0xa9   :  { %p996_p13 = scmp.ne.s32.totalorder %s1370_s1, %s995_s22  ;;  %p999_p0 = scmp.lt.u32.totalorder %s995_s22, %s1370_s1 }
  0xab   :  { %p1001_p1 = pnand %p999_p0, %p996_p13 }
  0xad   :  { %1004 = shalt.err (!%p1001_p1)
}
  0xae   :  { %s1017_s27 = smov 128   ;;  %s1018_s28 = smov 8  }
  0xaf   :  { %881 = dma.vmem_to_hbm [thread:$0]  %s876_s18, 1152, %s1370_s1, [#allocation4], %s1017_s27, %s1017_s27, %s1018_s28  }
  0xb0   :  { %1007 = dma.done.wait [#allocation4], 1152  }
  0xb1   :  { %1008 = vsyncadd [#allocation4], 4294966144 }
  0xb2   :  { %885 = vsyncpa [#allocation3], 1 }
  0xb3   :  { %886 = vsyncpa [#allocation4], 1 }

</bundles_post_ra>
